<compile_context>
chip_gen: v6e
topology: v6e:2x2x1
jax: 0.10.0
libtpu: 0.0.40
codegen_flags: <defaults>
</compile_context>

<pallas_src>
import functools

import jax
import jax.numpy as jnp
import numpy as np
from jax.experimental import pallas as pl
from jax.experimental.pallas import tpu as pltpu


def _round_up(v, m):
    return (v + m - 1) // m * m


def _pick_tb(batch):
    """Rows per grid step."""
    if batch <= 8:
        return max(batch, 1)           # one full-dim block (legal even if < 8 rows)
    # Largest 8-multiple tile, capped at 512, that still gives >= 2 grid steps:
    # big enough to amortize the ~600-cycle per-step overhead and fill >=256 MXU
    # rows on v6e/v7x, small enough that both v7x TensorCores get work.
    half = -(-batch // 2)              # ceil(batch / 2)
    return min(512, _round_up(half, 8))


def _parallel_actions_kernel(a_ref, x_ref, wt_ref, o_ref, *, n_mod):
    # a_ref:  (TB, 1)    int32 action per row
    # x_ref:  (TB, D)    input rows, true feature width (no lane padding in HBM)
    # wt_ref: (N*D, Dp)  VMEM-resident packed table, rows n*D..(n+1)*D = W[n]^T
    # o_ref:  (TB, Dp)   lane-dense output rows
    x = x_ref[...]
    a = a_ref[...]
    # Per-module masks in f32 (v5e VPU has no bf16), lane-concatenated into the
    # packed-K layout, then ONE MXU matmul against the packed weight table.
    parts = [jnp.where(a == n, x, 0.0) for n in range(n_mod)]
    x_packed = parts[0] if n_mod == 1 else jnp.concatenate(parts, axis=-1)
    x_packed = x_packed.astype(wt_ref.dtype)        # bf16 just before the dot
    o_ref[...] = jnp.dot(
        x_packed, wt_ref[...], preferred_element_type=jnp.float32
    ).astype(o_ref.dtype)


def parallel_actions(x, a, reps, cobs, use_cob=True):
    """Pallas implementation of ParallelActions.forward(x, a) (orders=None path).

    x:    (batch, D) float32
    a:    (batch,)   int action / module indices in [0, N)
    reps: (N, D, D)  float32  -- stacked mod.rep(None)
    cobs: (N, D, D)  float32  -- stacked mod.cob
    """
    batch, D = x.shape
    N = reps.shape[0]

    # ---- one-time W table (hoisted out of per-row work; plain JAX) ----
    if use_cob:
        a0 = cobs[0]
        a0_inv = jnp.linalg.inv(a0)
        w = jnp.einsum('ij,njk,kl->nil', a0_inv, reps, a0, precision='highest')
    else:
        w = reps                                     # skip identity cob matmuls
    # Fold the transpose (kernel computes y = x @ W^T) and pack the N blocks
    # along the contraction dim: wt_packed[n*D + k, j] = W[n][j, k].
    wt_flat = jnp.swapaxes(w, 1, 2).reshape(N * D, D)
    Dp = _round_up(D, 128)                           # lane-dense output stores
    if Dp == D:
        wt_packed = wt_flat.astype(jnp.bfloat16)
    else:
        wt_packed = (jnp.zeros((N * D, Dp), jnp.float32)
                     .at[:, :D].set(wt_flat).astype(jnp.bfloat16))

    TB = _pick_tb(batch)
    grid = (pl.cdiv(batch, TB),)                     # ragged tail rows are dropped by Pallas
    a2 = a.astype(jnp.int32).reshape(batch, 1)

    # Rough VMEM estimate (double-buffered tiles + packed intermediates); only
    # raise the scoped limit when needed (v7x: 64 MiB physical / 32 MiB default).
    vmem_est = (4 * TB * D * x.dtype.itemsize        # x tiles
                + 4 * TB * Dp * 4                    # out tiles
                + 2 * N * D * Dp * 2                 # bf16 weight table (dbl-buffered)
                + 2 * TB * N * D * 6)                # f32 + bf16 packed intermediates
    cp = dict(dimension_semantics=("parallel",))     # batch tiles are independent
    if vmem_est > 30 * 1024 * 1024:
        cp["vmem_limit_bytes"] = int(min(vmem_est * 2, 100 * 1024 * 1024))

    out = pl.pallas_call(
        functools.partial(_parallel_actions_kernel, n_mod=N),
        out_shape=jax.ShapeDtypeStruct((batch, Dp), x.dtype),
        grid=grid,
        in_specs=[
            pl.BlockSpec((TB, 1), lambda t: (t, 0)),         # actions
            pl.BlockSpec((TB, D), lambda t: (t, 0)),         # x tile, true width D
            pl.BlockSpec((N * D, Dp), lambda t: (0, 0)),     # packed Wt, VMEM-resident
        ],
        out_specs=pl.BlockSpec((TB, Dp), lambda t: (t, 0)),
        compiler_params=pltpu.CompilerParams(**cp),
    )(a2, x, wt_packed)

    return out if Dp == D else out[:, :D]


def _reference(x, a, reps, cobs, use_cob=True):
    # Pure-JAX reference mirroring the PyTorch broadcasting:
    # avail_weights[i, j] = inv(A[j]) @ B[i] @ A[j]; weights = avail_weights[a, 0]
    if use_cob:
        a0 = cobs[0]
        a0_inv = jnp.linalg.inv(a0)
        w_table = jnp.einsum('ij,njk,kl->nil', a0_inv, reps, a0, precision='highest')
    else:
        w_table = reps
    w = w_table[a]                                                  # (batch, D, D)
    return jnp.einsum('bij,bj->bi', w, x, precision='highest')     # (batch, D)


if __name__ == "__main__":
    key = jax.random.PRNGKey(0)
    k1, k2, k3, k4 = jax.random.split(key, 4)

    N = 4        # number of linear modules in linear_module_list
    D = 32       # feature dim of each module's cob / rep matrices
    batch = 8    # number of (x, a) pairs

    # deterministic synthetic parameters (no checkpoint loading)
    reps = jax.random.normal(k1, (N, D, D), dtype=jnp.float32)
    cobs = (0.1 * jax.random.normal(k2, (N, D, D), dtype=jnp.float32)
            + jnp.eye(D, dtype=jnp.float32)[None])        # well-conditioned, invertible
    x = jax.random.normal(k3, (batch, D), dtype=jnp.float32)
    a = jax.random.randint(k4, (batch,), 0, N, dtype=jnp.int32)

    # atol widened vs the f32 run: operands are now bf16 on the MXU (perf-review
    # item, f32 accumulation kept); rtol unchanged.
    RTOL, ATOL = 2e-2, 1.5e-1

    # use_cob=True (default module path)
    y = jax.block_until_ready(parallel_actions(x, a, reps, cobs, use_cob=True))
    y_ref = _reference(x, a, reps, cobs, use_cob=True)
    assert y.shape == (batch, D)
    assert np.allclose(np.asarray(y), np.asarray(y_ref), rtol=RTOL, atol=ATOL), \
        "Pallas result mismatch vs reference (use_cob=True)"

    # use_cob=False path (no change-of-basis matmuls at all)
    y2 = jax.block_until_ready(parallel_actions(x, a, reps, cobs, use_cob=False))
    y2_ref = _reference(x, a, reps, cobs, use_cob=False)
    assert np.allclose(np.asarray(y2), np.asarray(y2_ref), rtol=RTOL, atol=ATOL), \
        "Pallas result mismatch vs reference (use_cob=False)"

    # larger batch: exercises the multi-tile grid (>=2 steps) and the ragged
    # last block (batch=200 not a multiple of the tile size)
    kb1, kb2 = jax.random.split(k3)
    xb = jax.random.normal(kb1, (200, D), dtype=jnp.float32)
    ab = jax.random.randint(kb2, (200,), 0, N, dtype=jnp.int32)
    yb = jax.block_until_ready(parallel_actions(xb, ab, reps, cobs, use_cob=True))
    yb_ref = _reference(xb, ab, reps, cobs, use_cob=True)
    assert yb.shape == (200, D)
    assert np.allclose(np.asarray(yb), np.asarray(yb_ref), rtol=RTOL, atol=ATOL), \
        "Pallas result mismatch vs reference (batched/tiled path)"

    print("KERNEL_OK")
</pallas_src>

<mosaic_0001>
module attributes {stable_mosaic.version = 11 : i64} {
  func.func @_parallel_actions_kernel(%arg0: i32, %arg1: memref<8x1xi32, #tpu.memory_space<vmem>>, %arg2: memref<8x32xf32, #tpu.memory_space<vmem>>, %arg3: memref<128x128xbf16, #tpu.memory_space<vmem>>, %arg4: memref<8x128xf32, #tpu.memory_space<vmem>>) attributes {dimension_semantics = [#tpu.dimension_semantics<parallel>], iteration_bounds = array<i64: 1>, scalar_prefetch = 0 : i64, scratch_operands = 0 : i64, tpu.core_type = #tpu.core_type<tc>, window_params = [{transform_indices = @transform_0, window_bounds = array<i64: 8, 1>}, {transform_indices = @transform_1, window_bounds = array<i64: 8, 32>}, {pipeline_mode = #tpu.pipeline_mode<synchronous>, transform_indices = @transform_2, window_bounds = array<i64: 128, 128>}, {transform_indices = @transform_3, window_bounds = array<i64: 8, 128>}]} {
    %c0 = arith.constant 0 : index
    %c0_0 = arith.constant 0 : index
    %0 = vector.load %arg2[%c0, %c0_0] : memref<8x32xf32, #tpu.memory_space<vmem>>, vector<8x32xf32>
    %c0_1 = arith.constant 0 : index
    %c0_2 = arith.constant 0 : index
    %1 = vector.load %arg1[%c0_1, %c0_2] : memref<8x1xi32, #tpu.memory_space<vmem>>, vector<8x1xi32>
    %c0_i32 = arith.constant 0 : i32
    %2 = vector.broadcast %c0_i32 : i32 to vector<8x1xi32>
    %3 = arith.cmpi eq, %1, %2 : vector<8x1xi32>
    %cst = arith.constant 0.000000e+00 : f32
    %4 = vector.shape_cast %3 : vector<8x1xi1> to vector<8x1xi1>
    %5 = vector.broadcast %4 : vector<8x1xi1> to vector<8x32xi1>
    %6 = vector.broadcast %cst : f32 to vector<8x32xf32>
    %7 = arith.select %5, %0, %6 : vector<8x32xi1>, vector<8x32xf32>
    %c1_i32 = arith.constant 1 : i32
    %8 = vector.broadcast %c1_i32 : i32 to vector<8x1xi32>
    %9 = arith.cmpi eq, %1, %8 : vector<8x1xi32>
    %cst_3 = arith.constant 0.000000e+00 : f32
    %10 = vector.shape_cast %9 : vector<8x1xi1> to vector<8x1xi1>
    %11 = vector.broadcast %10 : vector<8x1xi1> to vector<8x32xi1>
    %12 = vector.broadcast %cst_3 : f32 to vector<8x32xf32>
    %13 = arith.select %11, %0, %12 : vector<8x32xi1>, vector<8x32xf32>
    %c2_i32 = arith.constant 2 : i32
    %14 = vector.broadcast %c2_i32 : i32 to vector<8x1xi32>
    %15 = arith.cmpi eq, %1, %14 : vector<8x1xi32>
    %cst_4 = arith.constant 0.000000e+00 : f32
    %16 = vector.shape_cast %15 : vector<8x1xi1> to vector<8x1xi1>
    %17 = vector.broadcast %16 : vector<8x1xi1> to vector<8x32xi1>
    %18 = vector.broadcast %cst_4 : f32 to vector<8x32xf32>
    %19 = arith.select %17, %0, %18 : vector<8x32xi1>, vector<8x32xf32>
    %c3_i32 = arith.constant 3 : i32
    %20 = vector.broadcast %c3_i32 : i32 to vector<8x1xi32>
    %21 = arith.cmpi eq, %1, %20 : vector<8x1xi32>
    %cst_5 = arith.constant 0.000000e+00 : f32
    %22 = vector.shape_cast %21 : vector<8x1xi1> to vector<8x1xi1>
    %23 = vector.broadcast %22 : vector<8x1xi1> to vector<8x32xi1>
    %24 = vector.broadcast %cst_5 : f32 to vector<8x32xf32>
    %25 = arith.select %23, %0, %24 : vector<8x32xi1>, vector<8x32xf32>
    %26 = tpu.concatenate %7, %13, %19, %25 in 1 : vector<8x32xf32>, vector<8x32xf32>, vector<8x32xf32>, vector<8x32xf32> -> vector<8x128xf32>
    %27 = arith.truncf %26 : vector<8x128xf32> to vector<8x128xbf16>
    %c0_6 = arith.constant 0 : index
    %c0_7 = arith.constant 0 : index
    %28 = vector.load %arg3[%c0_6, %c0_7] : memref<128x128xbf16, #tpu.memory_space<vmem>>, vector<128x128xbf16>
    %cst_8 = arith.constant dense<0.000000e+00> : vector<8x128xf32>
    %29 = tpu.matmul %27, %28, %cst_8 {dimension_numbers = #tpu.dot_dimension_numbers<[1], [0], [0], [1], [0, 0, 1, 1], [], []>} : vector<8x128xbf16>, vector<128x128xbf16>, vector<8x128xf32> -> vector<8x128xf32>
    %c0_9 = arith.constant 0 : index
    %c0_10 = arith.constant 0 : index
    %30 = vector.load %arg4[%c0_9, %c0_10] : memref<8x128xf32, #tpu.memory_space<vmem>>, vector<8x128xf32>
    tpu.vector_store %arg4[%c0_9, %c0_10], %29 {strides = array<i32>} : memref<8x128xf32, #tpu.memory_space<vmem>>, vector<8x128xf32>,
    return
  }
  func.func @transform_0(%arg0: i32) -> (i32, i32) {
    %c0_i32 = arith.constant 0 : i32
    %c0_i32_0 = arith.constant 0 : i32
    return %arg0, %c0_i32 : i32, i32
  }
  func.func @transform_1(%arg0: i32) -> (i32, i32) {
    %c0_i32 = arith.constant 0 : i32
    %c0_i32_0 = arith.constant 0 : i32
    return %arg0, %c0_i32 : i32, i32
  }
  func.func @transform_2(%arg0: i32) -> (i32, i32) {
    %c0_i32 = arith.constant 0 : i32
    %c0_i32_0 = arith.constant 0 : i32
    %c0_i32_1 = arith.constant 0 : i32
    return %c0_i32, %c0_i32_0 : i32, i32
  }
  func.func @transform_3(%arg0: i32) -> (i32, i32) {
    %c0_i32 = arith.constant 0 : i32
    %c0_i32_0 = arith.constant 0 : i32
    return %arg0, %c0_i32 : i32, i32
  }
}

</mosaic_0001>

<bundles_post_ra>
// kernel: tpu_custom_call.1
= control target key start
LH: loop header
LB: loop body
LE: loop exit
PB: predicated region body
PF: predicated region fallthrough
CT: control target
= control target key end

     0   :  { %8 = vsyncpa [#allocation3], 0  ;;  %s343_s0 = inlined_call_operand.vmem [shape: s32[8,1], index: 0, kind: input, shape index: {}]   ;;  %s344_s1 = inlined_call_operand.vmem [shape: f32[8,32], index: 1, kind: input, shape index: {}]   ;;  %s345_s2 = inlined_call_operand.hbm [shape: bf16[128,128], index: 2, kind: input, shape index: {}]   ;;  %s346_s3 = inlined_call_operand.hbm [shape: f32[8,128], index: 3, kind: output, shape index: {}]  }
   0x1   :  { %9 = vsyncpa [#allocation4], 0  ;;  %s299_s12 = smov [#allocation2]  }
   0x2   :  { %s19_s13 = sshll.u32 %s299_s12, 4  ;;  %s20_s13 = int_to_ptr.vmem [resolvable:$true] %s19_s13 }
   0x3   :  { %s263_s14 = scalar_lea.vmem %s20_s13, 1024  ;;  %p268_p1 = scmp.lt.s32.totalorder %s20_s13, %s20_s13 }
   0x4   :  { %p264_p0 = scmp.ne.s32.totalorder %s20_s13, %s263_s14  ;;  %p269_p2 = scmp.lt.s32.totalorder %s263_s14, %s263_s14 }
   0x6   :  { %p270_p3 = por %p269_p2, %p268_p1 }
   0x8   :  { %p271_p4 = pnand %p270_p3, %p264_p0 }
   0xa   :  { %274 = shalt.err (!%p271_p4)
}
   0xb   :  { %s300_s15 = smov 64   ;;  %s301_s16 = smov 4  }
   0xc   :  { %25 = dma.hbm_to_vmem [thread:$0]  %s345_s2, 1024, %s20_s13, [#allocation3], %s300_s15, %s300_s15, %s301_s16  }
   0xd   :  { %295 = dma.done.wait [#allocation3], 1024  }
   0xe   :  { %296 = vsyncadd [#allocation3], 4294966272  ;;  %v302_v0 = vmov 0   ;;  %v31_v1 = vld [vmem:[%s343_s0] sm:$0xff]  ;;  %v247_v6 = vld [vmem:[#allocation2 + $0x38] sm:$0xff]   ;;  %v303_v7 = vmov 0.0  }
   0xf   :  { %245 = vset.pattern.permute.xlu0 %v302_v0  ;;  %246 = vset.pattern.permute.xlu1 %v302_v0  ;;  %vm39_vm0 = vcmp.eq.s32.totalorder %v31_v1, 1  ;;  %vm53_vm1 = vcmp.eq.s32.totalorder %v31_v1, 3  ;;  %vm46_vm2 = vcmp.eq.s32.totalorder %v31_v1, 2  ;;  %vm32_vm3 = vcmp.eq.s32.totalorder %v31_v1, 0  ;;  %v248_v8 = vld [vmem:[#allocation2 + $0x30] sm:$0xff]   ;;  %v249_v9 = vld [vmem:[#allocation2 + $0x28] sm:$0xff]  }
  0x10   :  { %v40_v2 = vsel %vm39_vm0, 1, %v302_v0  ;;  %v54_v3 = vsel %vm53_vm1, 1, %v302_v0  ;;  %v47_v4 = vsel %vm46_vm2, 1, %v302_v0  ;;  %v33_v5 = vsel %vm32_vm3, 1, %v302_v0  ;;  %216 = vmatprep.subr.bf16.mxu0 %v303_v7  ;;  %v250_v10 = vld [vmem:[#allocation2 + $0x20] sm:$0xff]   ;;  %v251_v11 = vld [vmem:[#allocation2 + $0x18] sm:$0xff]  }
  0x11   :  { %42 = vperm.xlu0 %245, %v40_v2   ;;  %56 = vperm.xlu1 %246, %v54_v3   ;;  %v252_v12 = vld [vmem:[#allocation2 + $0x10] sm:$0xff]   ;;  %v253_v13 = vld [vmem:[#allocation2 + $0x8] sm:$0xff]   ;;  %v254_v14 = vld [vmem:[#allocation2] sm:$0xff]   ;;  %vm304_vm4 = vmmov 0   ;;  %s305_s21 = smov 32   ;;  %s306_s22 = smov 96  }
  0x12   :  { %217 = vmatpush3.bf16.msra.mxu0 %v247_v6  ;;  %232 = vmatprep.mubr.msk.bf16.mxu0 %vm304_vm4, %v303_v7  ;;  %v30_v15 = vld [vmem:[%s344_s1] sm:$0xff]  ;;  %vm72_vm9 = vcmask 261120   ;;  %vm74_vm10 = vcmask 523264   ;;  %vm76_vm11 = vcmask 785408   ;;  %s307_s1 = smov [#allocation5]  }
  0x13   :  { %218 = vmatprep.subr.bf16.mxu0 %v303_v7  ;;  %s190_s23 = sshll.u32 %s307_s1, 4  ;;  %s191_s23 = int_to_ptr.vmem [resolvable:$true] %s190_s23 }
  0x14   :  { %s275_s24 = scalar_lea.vmem %s191_s23, 128  ;;  %p280_p6 = scmp.lt.s32.totalorder %s191_s23, %s191_s23 }
  0x15   :  { %49 = vperm.xlu0 %245, %v47_v4   ;;  %35 = vperm.xlu1 %246, %v33_v5   ;;  %p276_p5 = scmp.ne.s32.totalorder %s191_s23, %s275_s24  ;;  %p281_p7 = scmp.lt.s32.totalorder %s275_s24, %s275_s24 }
  0x16   :  { %219 = vmatpush3.bf16.msra.mxu0 %v248_v8 }
  0x17   :  { %220 = vmatprep.subr.bf16.mxu0 %v303_v7  ;;  %p282_p8 = por %p281_p7, %p280_p6 }
  0x19   :  { %p283_p9 = pnand %p282_p8, %p276_p5 }
  0x1a   :  { %221 = vmatpush3.bf16.msra.mxu0 %v249_v9 }
  0x1b   :  { %222 = vmatprep.subr.bf16.mxu0 %v303_v7 }
  0x1e   :  { %223 = vmatpush3.bf16.msra.mxu0 %v250_v10 }
  0x1f   :  { %224 = vmatprep.subr.bf16.mxu0 %v303_v7 }
  0x22   :  { %225 = vmatpush3.bf16.msra.mxu0 %v251_v11 }
  0x23   :  { %226 = vmatprep.subr.bf16.mxu0 %v303_v7 }
  0x26   :  { %227 = vmatpush3.bf16.msra.mxu0 %v252_v12 }
  0x27   :  { %228 = vmatprep.subr.bf16.mxu0 %v303_v7 }
  0x2a   :  { %229 = vmatpush3.bf16.msra.mxu0 %v253_v13 }
  0x2b   :  { %230 = vmatprep.subr.bf16.mxu0 %v303_v7 }
  0x2e   :  { %231 = vmatpush3.bf16.msra.mxu0 %v254_v14 }
  0x8c   :  { %v43_v16 = vpop.permute.xlu0 %42  ;;  %v57_v17 = vpop.permute.xlu1 %56 }
  0x8d   :  { %vm44_vm5 = vcmp.eq.s32.totalorder %v43_v16, 1  ;;  %vm58_vm6 = vcmp.eq.s32.totalorder %v57_v17, 1 }
  0x8e   :  { %v45_v18 = vsel %vm44_vm5, %v30_v15, 0.0  ;;  %v59_v19 = vsel %vm58_vm6, %v30_v15, 0.0 }
  0x8f   :  { %61 = vrot.lane.b32.xlu0 %v45_v18, %s305_s21 }
  0x90   :  { %v50_v20 = vpop.permute.xlu0 %49  ;;  %v36_v22 = vpop.permute.xlu1 %35 }
  0x91   :  { %vm51_vm7 = vcmp.eq.s32.totalorder %v50_v20, 1  ;;  %vm37_vm8 = vcmp.eq.s32.totalorder %v36_v22, 1 }
  0x92   :  { %v52_v21 = vsel %vm51_vm7, %v30_v15, 0.0  ;;  %v38_v24 = vsel %vm37_vm8, %v30_v15, 0.0 }
  0x93   :  { %65 = vrot.lane.b32.xlu1 %v52_v21, %s300_s15  ;;  %69 = vrot.lane.b32.xlu0 %v59_v19, %s306_s22 }
 0x101   :  { %v62_v23 = vpop.permute.xlu0 %61 }
 0x102   :  { %v73_v25 = vsel %vm72_vm9, %v38_v24, %v62_v23 }
 0x105   :  { %v66_v26 = vpop.permute.xlu1 %65  ;;  %v70_v27 = vpop.permute.xlu0 %69 }
 0x106   :  { %v75_v28 = vsel %vm74_vm10, %v73_v25, %v66_v26 }
 0x107   :  { %v77_v29 = vsel %vm76_vm11, %v75_v28, %v70_v27 }
 0x108   :  { %v78_v30 = vpack.c.bf16 %v77_v29, %v77_v29 }
 0x10a   :  { %233 = vmatmul.mubr.bf16.vlgmr.msra.gmra.mxu0 %v78_v30 }
 0x1ca   :  { %v177_v31 = vpop.f32.mrf.mxu0 }
 0x1cb   :  { %183 = vst [vmem:[#allocation5] sm:$0xff] %v177_v31 }
 0x1cc   :  { %v234_v32 = vpop.f32.mrf.mxu0 }
 0x1cd   :  { %286 = shalt.err (!%p283_p9)
}
 0x1ce   :  { %193 = dma.vmem_to_hbm [thread:$0]  %s191_s23, 128, %s346_s3, [#allocation4]   ;;  %v180_v33 = vpop.f32.mrf.mxu0 }
 0x1d0   :  { %v235_v34 = vpop.f32.mrf.mxu0 }
 0x1d1   :  { %297 = dma.done.wait [#allocation4], 128  }
 0x1d2   :  { %298 = vsyncadd [#allocation4], 4294967168 }
 0x1d3   :  { %197 = vsyncpa [#allocation3], 1 }
 0x1d4   :  { %198 = vsyncpa [#allocation4], 1 }

</bundles_post_ra>
